<compile_context>
chip_gen: v5e
topology: v5e:2x2
jax: 0.10.0
libtpu: 0.0.40
codegen_flags: <defaults>
</compile_context>

<pallas_src>
import functools

import jax
import jax.numpy as jnp
from jax.experimental import pallas as pl
from jax.experimental.pallas import tpu as pltpu

_LANE = 128
_SUBLANE = 8
_VREG_ELEMS = _SUBLANE * _LANE          # 1024: pad granularity (one f32 vreg)
_MAX_BLOCK_ROWS = 4096                  # 2 MiB / f32 buffer -> 8 MiB double-buffered
_NUM_CORES = 2                          # v7x TC count; harmless serial axis elsewhere
_BYPASS_ELEMS = 64 * 1024               # tiny inputs: plain XLA reduction is faster


def _loss_profit_kernel(sched_ref, price_ref, acc_ref, *,
                        rows, steps, block_rows, needs_mask):
    """Per-core partial sum of sched*price into a resident (8,128) f32 block."""
    i = pl.program_id(1)

    @pl.when(i == 0)
    def _init():
        acc_ref[...] = jnp.zeros_like(acc_ref)

    prod = sched_ref[...].astype(jnp.float32) * price_ref[...].astype(jnp.float32)

    if needs_mask:  # static: only emitted when a partial/duplicated block exists
        c = pl.program_id(0)
        bidx = c * steps + i
        valid = rows - bidx * block_rows          # <= 0 for fully-OOB slots
        row_ids = jax.lax.broadcasted_iota(jnp.int32, (block_rows, _LANE), 0)
        prod = jnp.where(row_ids < valid, prod, 0.0)

    # Pure VALU vreg adds: (block_rows,128) -> (8,128).  XLU reduce happens
    # only once, outside the kernel, on the (cores*8,128) partials.
    acc_ref[...] += prod.reshape(block_rows // _SUBLANE, _SUBLANE, _LANE).sum(axis=0)


def _loss_profit_pallas(output, prices):
    n = int(output.size)

    # Pad flat length only to one vreg group (<=1023 extra elems); no-op (and no
    # HBM copy) when n is already a multiple of 1024.
    padded = ((n + _VREG_ELEMS - 1) // _VREG_ELEMS) * _VREG_ELEMS
    rows = padded // _LANE                       # multiple of 8

    def _prep(a):
        a = a.reshape(-1)
        if padded != n:
            a = jnp.pad(a, (0, padded - n))      # zero padding is sum-neutral
        return a.reshape(rows, _LANE)

    sched2d = _prep(output)
    price2d = _prep(prices)

    block_rows = min(_MAX_BLOCK_ROWS, rows)      # multiple of 8, <= rows
    num_blocks = pl.cdiv(rows, block_rows)
    ncores = _NUM_CORES if num_blocks >= _NUM_CORES else 1
    steps = pl.cdiv(num_blocks, ncores)
    # Mask needed if the last block is partial or a core has a duplicated slot.
    needs_mask = (ncores * steps * block_rows) != rows

    if ncores * steps == num_blocks:
        def row_block(c, i):
            return (c * steps + i, 0)
    else:
        def row_block(c, i):
            # Clamp duplicated trailing slots onto the last real block; their
            # contribution is zeroed by the in-kernel mask.
            return (jnp.minimum(c * steps + i, num_blocks - 1), 0)

    in_bytes = padded * (output.dtype.itemsize + prices.dtype.itemsize)
    cost = pl.CostEstimate(
        flops=2 * n,
        transcendentals=0,
        bytes_accessed=in_bytes + ncores * _SUBLANE * _LANE * 4,
    )

    partials = pl.pallas_call(
        functools.partial(_loss_profit_kernel, rows=rows, steps=steps,
                          block_rows=block_rows, needs_mask=needs_mask),
        out_shape=jax.ShapeDtypeStruct((ncores * _SUBLANE, _LANE), jnp.float32),
        grid_spec=pltpu.PrefetchScalarGridSpec(
            num_scalar_prefetch=0,
            grid=(ncores, steps),
            in_specs=[
                pl.BlockSpec((block_rows, _LANE), row_block),   # schedules
                pl.BlockSpec((block_rows, _LANE), row_block),   # prices
            ],
            out_specs=pl.BlockSpec((_SUBLANE, _LANE), lambda c, i: (c, 0)),
        ),
        compiler_params=pltpu.CompilerParams(
            dimension_semantics=("parallel", "arbitrary"),
            vmem_limit_bytes=32 * 1024 * 1024,
        ),
        cost_estimate=cost,
    )(sched2d, price2d)

    return -jnp.sum(partials)


def _loss_profit_fwd_impl(output, prices):
    assert output.shape == prices.shape, "output and prices must have the same shape"
    n = int(output.size)
    if n <= _BYPASS_ELEMS:
        # Tiny inputs: pad/reshape + per-step overhead would dominate.
        return -jnp.sum(output.astype(jnp.float32) * prices.astype(jnp.float32))
    return _loss_profit_pallas(output, prices)


@jax.custom_vjp
def loss_profit(output, prices):
    """Loss_profit.forward: returns -sum(output * prices) as an f32 scalar."""
    return _loss_profit_fwd_impl(output, prices)


def _loss_profit_vjp_fwd(output, prices):
    return _loss_profit_fwd_impl(output, prices), (output, prices)


def _loss_profit_vjp_bwd(res, g):
    output, prices = res
    g = g.astype(jnp.float32)
    d_output = (-g * prices.astype(jnp.float32)).astype(output.dtype)
    d_prices = (-g * output.astype(jnp.float32)).astype(prices.dtype)
    return d_output, d_prices


loss_profit.defvjp(_loss_profit_vjp_fwd, _loss_profit_vjp_bwd)


if __name__ == "__main__":
    key = jax.random.PRNGKey(0)
    k1, k2, k3, k4, k5, k6 = jax.random.split(key, 6)

    # Small batch-of-schedules x horizon case (tiny-input bypass path).
    out_s = jax.random.normal(k1, (4, 48), dtype=jnp.float32)
    pr_s = jax.random.normal(k2, (4, 48), dtype=jnp.float32)
    loss_s = jax.block_until_ready(loss_profit(out_s, pr_s))
    ref_s = -jnp.sum(out_s * pr_s)
    assert jnp.allclose(loss_s, ref_s, atol=1e-3, rtol=1e-5), (loss_s, ref_s)

    # Gradient check (custom VJP, required for use as a training loss).
    g_out, g_pr = jax.grad(loss_profit, argnums=(0, 1))(out_s, pr_s)
    assert jnp.allclose(g_out, -pr_s, atol=1e-5), "d/d_output mismatch"
    assert jnp.allclose(g_pr, -out_s, atol=1e-5), "d/d_prices mismatch"

    # Aligned mid-size case: Pallas path, single block, zero padding needed.
    out_m = jax.random.normal(k3, (64, 96, 24), dtype=jnp.float32)
    pr_m = jax.random.normal(k4, (64, 96, 24), dtype=jnp.float32)
    loss_m = jax.block_until_ready(loss_profit(out_m, pr_m))
    ref_m = -jnp.sum(out_m * pr_m)
    assert jnp.allclose(loss_m, ref_m, atol=5e-2, rtol=1e-4), (loss_m, ref_m)

    # Unaligned multi-block case: exercises the two-core split + tail masking.
    out_l = jax.random.normal(k5, (17, 257, 123), dtype=jnp.float32)
    pr_l = jax.random.normal(k6, (17, 257, 123), dtype=jnp.float32)
    loss_l = jax.block_until_ready(loss_profit(out_l, pr_l))
    ref_l = -jnp.sum(out_l * pr_l)
    assert jnp.allclose(loss_l, ref_l, atol=1e-1, rtol=1e-3), (loss_l, ref_l)

    print("KERNEL_OK")
</pallas_src>

<mosaic_0001>
module attributes {stable_mosaic.version = 11 : i64} {
  func.func @_loss_profit_kernel(%arg0: i32, %arg1: i32, %arg2: memref<1152x128xf32, #tpu.memory_space<vmem>>, %arg3: memref<1152x128xf32, #tpu.memory_space<vmem>>, %arg4: memref<8x128xf32, #tpu.memory_space<vmem>>) attributes {dimension_semantics = [#tpu.dimension_semantics<parallel>, #tpu.dimension_semantics<arbitrary>], iteration_bounds = array<i64: 1, 1>, scalar_prefetch = 0 : i64, scratch_operands = 0 : i64, tpu.core_type = #tpu.core_type<tc>, window_params = [{transform_indices = @transform_0, window_bounds = array<i64: 1152, 128>}, {transform_indices = @transform_1, window_bounds = array<i64: 1152, 128>}, {transform_indices = @transform_2, window_bounds = array<i64: 8, 128>}]} {
    %c0_i32 = arith.constant 0 : i32
    %0 = arith.cmpi eq, %arg1, %c0_i32 : i32
    %1 = arith.extui %0 : i1 to i32
    %c0_i32_0 = arith.constant 0 : i32
    %2 = arith.cmpi ne, %1, %c0_i32_0 : i32
    scf.if %2 {
      %cst_8 = arith.constant 0.000000e+00 : f32
      %11 = vector.broadcast %cst_8 : f32 to vector<8x128xf32>
      %c0_9 = arith.constant 0 : index
      %c0_10 = arith.constant 0 : index
      %12 = vector.load %arg4[%c0_9, %c0_10] : memref<8x128xf32, #tpu.memory_space<vmem>>, vector<8x128xf32>
      tpu.vector_store %arg4[%c0_9, %c0_10], %11 {strides = array<i32>} : memref<8x128xf32, #tpu.memory_space<vmem>>, vector<8x128xf32>,
    } else {
    }
    %c0 = arith.constant 0 : index
    %c0_1 = arith.constant 0 : index
    %3 = vector.load %arg2[%c0, %c0_1] : memref<1152x128xf32, #tpu.memory_space<vmem>>, vector<1152x128xf32>
    %c0_2 = arith.constant 0 : index
    %c0_3 = arith.constant 0 : index
    %4 = vector.load %arg3[%c0_2, %c0_3] : memref<1152x128xf32, #tpu.memory_space<vmem>>, vector<1152x128xf32>
    %5 = arith.mulf %3, %4 : vector<1152x128xf32>
    %c0_4 = arith.constant 0 : index
    %c0_5 = arith.constant 0 : index
    %6 = vector.load %arg4[%c0_4, %c0_5] : memref<8x128xf32, #tpu.memory_space<vmem>>, vector<8x128xf32>
    %7 = vector.shape_cast %5 : vector<1152x128xf32> to vector<144x8x128xf32>
    %cst = arith.constant dense<0.000000e+00> : vector<8x128xf32>
    %8 = vector.multi_reduction <add>, %7, %cst [0] : vector<144x8x128xf32> to vector<8x128xf32>
    %9 = arith.addf %6, %8 : vector<8x128xf32>
    %c0_6 = arith.constant 0 : index
    %c0_7 = arith.constant 0 : index
    %10 = vector.load %arg4[%c0_6, %c0_7] : memref<8x128xf32, #tpu.memory_space<vmem>>, vector<8x128xf32>
    tpu.vector_store %arg4[%c0_6, %c0_7], %9 {strides = array<i32>} : memref<8x128xf32, #tpu.memory_space<vmem>>, vector<8x128xf32>,
    return
  }
  func.func @transform_0(%arg0: i32, %arg1: i32) -> (i32, i32) {
    %c1_i32 = arith.constant 1 : i32
    %0 = arith.muli %arg0, %c1_i32 : i32
    %1 = arith.addi %0, %arg1 : i32
    %c0_i32 = arith.constant 0 : i32
    %c0_i32_0 = arith.constant 0 : i32
    return %1, %c0_i32 : i32, i32
  }
  func.func @transform_1(%arg0: i32, %arg1: i32) -> (i32, i32) {
    %c1_i32 = arith.constant 1 : i32
    %0 = arith.muli %arg0, %c1_i32 : i32
    %1 = arith.addi %0, %arg1 : i32
    %c0_i32 = arith.constant 0 : i32
    %c0_i32_0 = arith.constant 0 : i32
    return %1, %c0_i32 : i32, i32
  }
  func.func @transform_2(%arg0: i32, %arg1: i32) -> (i32, i32) {
    %c0_i32 = arith.constant 0 : i32
    %c0_i32_0 = arith.constant 0 : i32
    return %arg0, %c0_i32 : i32, i32
  }
}

</mosaic_0001>

<bundles_post_ra>
// kernel: tpu_custom_call.1
= control target key start
LH: loop header
LB: loop body
LE: loop exit
PB: predicated region body
PF: predicated region fallthrough
CT: control target
= control target key end

     0   :  { %7 = vsyncpa [#allocation3], 0  ;;  %s770_s0 = inlined_call_operand.hbm [shape: f32[1152,128], index: 0, kind: input, shape index: {}]   ;;  %s771_s1 = inlined_call_operand.hbm [shape: f32[1152,128], index: 1, kind: input, shape index: {}]   ;;  %s772_s2 = inlined_call_operand.hbm [shape: f32[8,128], index: 2, kind: output, shape index: {}]  }
   0x1   :  { %8 = vsyncpa [#allocation6], 0 }
   0x2   :  { %9 = vsyncpa [#allocation4], 0  ;;  %s18_s11 = sshll.u32 %s770_s0, 4  ;;  %s741_s12 = smov [#allocation2]   ;;  %s19_s11 = int_to_ptr.hbm [resolvable:$true] %s18_s11 }
   0x3   :  { %s20_s13 = sshll.u32 %s741_s12, 4  ;;  %s35_s16 = sshll.u32 %s771_s1, 4  ;;  %s21_s13 = int_to_ptr.vmem [resolvable:$true] %s20_s13  ;;  %s36_s16 = int_to_ptr.hbm [resolvable:$true] %s35_s16 }
   0x4   :  { %s742_s17 = smov 128   ;;  %s743_s18 = smov 8  }
   0x5   :  { %26 = dma.hbm_to_vmem [thread:$0]  %s19_s11, 18432, %s21_s13, [#allocation3], %s742_s17, %s742_s17, %s743_s18  }
   0x6   :  { %s744_s19 = smov [#allocation5]  }
   0x7   :  { %s37_s20 = sshll.u32 %s744_s19, 4  ;;  %s38_s20 = int_to_ptr.vmem [resolvable:$true] %s37_s20 }
   0x8   :  { %43 = dma.hbm_to_vmem [thread:$0]  %s36_s16, 18432, %s38_s20, [#allocation6], %s742_s17, %s742_s17, %s743_s18  }
   0x9   :  { %735 = dma.done.wait [#allocation3], 18432  }
   0xa   :  { %736 = vsyncadd [#allocation3], 4294948864 }
   0xb   :  { %737 = dma.done.wait [#allocation6], 18432  }
   0xc   :  { %738 = vsyncadd [#allocation6], 4294948864  ;;  %v61_v0 = vld [vmem:[#allocation2] sm:$0xff]  ;;  %v62_v1 = vld [vmem:[#allocation2 + $0x8] sm:$0xff]  ;;  %s745_s0 = smov [#allocation7]   ;;  %s646_s23 = sshll.u32 %s772_s2, 4  ;;  %s647_s23 = int_to_ptr.hbm [resolvable:$true] %s646_s23 }
   0xd   :  { %v205_v2 = vld [vmem:[#allocation5] sm:$0xff]  ;;  %v206_v3 = vld [vmem:[#allocation5 + $0x8] sm:$0xff]  ;;  %v63_v6 = vld [vmem:[#allocation2 + $0x10] sm:$0xff]  ;;  %s644_s1 = sshll.u32 %s745_s0, 4  ;;  %s645_s1 = int_to_ptr.vmem [resolvable:$true] %s644_s1 }
   0xe   :  { %v349_v4 = vmul.f32 %v205_v2, %v61_v0  ;;  %v350_v5 = vmul.f32 %v206_v3, %v62_v1  ;;  %v207_v7 = vld [vmem:[#allocation5 + $0x10] sm:$0xff]  ;;  %v64_v10 = vld [vmem:[#allocation2 + $0x18] sm:$0xff]  ;;  %v65_v14 = vld [vmem:[#allocation2 + $0x20] sm:$0xff] }
   0xf   :  { %v351_v8 = vmul.f32 %v207_v7, %v63_v6  ;;  %v208_v11 = vld [vmem:[#allocation5 + $0x18] sm:$0xff]  ;;  %v209_v15 = vld [vmem:[#allocation5 + $0x20] sm:$0xff]  ;;  %v66_v18 = vld [vmem:[#allocation2 + $0x28] sm:$0xff] }
  0x10   :  { %v494_v9 = vadd.f32 %v350_v5, %v349_v4  ;;  %v352_v12 = vmul.f32 %v208_v11, %v64_v10  ;;  %v353_v16 = vmul.f32 %v209_v15, %v65_v14  ;;  %v210_v19 = vld [vmem:[#allocation5 + $0x28] sm:$0xff]  ;;  %v67_v22 = vld [vmem:[#allocation2 + $0x30] sm:$0xff]  ;;  %v68_v26 = vld [vmem:[#allocation2 + $0x38] sm:$0xff] }
  0x11   :  { %v354_v20 = vmul.f32 %v210_v19, %v66_v18  ;;  %v211_v23 = vld [vmem:[#allocation5 + $0x30] sm:$0xff]  ;;  %v212_v27 = vld [vmem:[#allocation5 + $0x38] sm:$0xff]  ;;  %v69_v28 = vld [vmem:[#allocation2 + $0x40] sm:$0xff] }
  0x12   :  { %v495_v13 = vadd.f32 %v494_v9, %v351_v8  ;;  %v355_v24 = vmul.f32 %v211_v23, %v67_v22  ;;  %v213_v29 = vld [vmem:[#allocation5 + $0x40] sm:$0xff]  ;;  %v356_v30 = vmul.f32 %v212_v27, %v68_v26  ;;  %v70_v32 = vld [vmem:[#allocation2 + $0x48] sm:$0xff]  ;;  %v71_v35 = vld [vmem:[#allocation2 + $0x50] sm:$0xff] }
  0x13   :  { %v214_v33 = vld [vmem:[#allocation5 + $0x48] sm:$0xff]  ;;  %v357_v34 = vmul.f32 %v213_v29, %v69_v28  ;;  %v215_v36 = vld [vmem:[#allocation5 + $0x50] sm:$0xff]  ;;  %v72_v39 = vld [vmem:[#allocation2 + $0x58] sm:$0xff] }
  0x14   :  { %v496_v17 = vadd.f32 %v495_v13, %v352_v12  ;;  %v358_v37 = vmul.f32 %v214_v33, %v70_v32  ;;  %v216_v40 = vld [vmem:[#allocation5 + $0x58] sm:$0xff]  ;;  %v359_v41 = vmul.f32 %v215_v36, %v71_v35  ;;  %v73_v43 = vld [vmem:[#allocation2 + $0x60] sm:$0xff]  ;;  %v74_v47 = vld [vmem:[#allocation2 + $0x68] sm:$0xff] }
  0x15   :  { %v217_v44 = vld [vmem:[#allocation5 + $0x60] sm:$0xff]  ;;  %v360_v45 = vmul.f32 %v216_v40, %v72_v39  ;;  %v218_v48 = vld [vmem:[#allocation5 + $0x68] sm:$0xff]  ;;  %v75_v51 = vld [vmem:[#allocation2 + $0x70] sm:$0xff] }
  0x16   :  { %v497_v21 = vadd.f32 %v496_v17, %v353_v16  ;;  %v361_v49 = vmul.f32 %v217_v44, %v73_v43  ;;  %v219_v52 = vld [vmem:[#allocation5 + $0x70] sm:$0xff]  ;;  %v362_v53 = vmul.f32 %v218_v48, %v74_v47  ;;  %v76_v55 = vld [vmem:[#allocation2 + $0x78] sm:$0xff]  ;;  %v77_v59 = vld [vmem:[#allocation2 + $0x80] sm:$0xff] }
  0x17   :  { %v220_v56 = vld [vmem:[#allocation5 + $0x78] sm:$0xff]  ;;  %v363_v57 = vmul.f32 %v219_v52, %v75_v51  ;;  %v221_v60 = vld [vmem:[#allocation5 + $0x80] sm:$0xff]  ;;  %v78_v63 = vld [vmem:[#allocation2 + $0x88] sm:$0xff] }
  0x18   :  { %v498_v25 = vadd.f32 %v497_v21, %v354_v20  ;;  %v364_v61 = vmul.f32 %v220_v56, %v76_v55  ;;  %v222_v0 = vld [vmem:[#allocation5 + $0x88] sm:$0xff]  ;;  %v365_v1 = vmul.f32 %v221_v60, %v77_v59  ;;  %v79_v3 = vld [vmem:[#allocation2 + $0x90] sm:$0xff]  ;;  %v80_v7 = vld [vmem:[#allocation2 + $0x98] sm:$0xff] }
  0x19   :  { %v223_v4 = vld [vmem:[#allocation5 + $0x90] sm:$0xff]  ;;  %v366_v5 = vmul.f32 %v222_v0, %v78_v63  ;;  %v224_v8 = vld [vmem:[#allocation5 + $0x98] sm:$0xff]  ;;  %v81_v11 = vld [vmem:[#allocation2 + $0xa0] sm:$0xff] }
  0x1a   :  { %v499_v31 = vadd.f32 %v498_v25, %v355_v24  ;;  %v367_v9 = vmul.f32 %v223_v4, %v79_v3  ;;  %v225_v12 = vld [vmem:[#allocation5 + $0xa0] sm:$0xff]  ;;  %v368_v13 = vmul.f32 %v224_v8, %v80_v7  ;;  %v82_v15 = vld [vmem:[#allocation2 + $0xa8] sm:$0xff]  ;;  %v83_v19 = vld [vmem:[#allocation2 + $0xb0] sm:$0xff] }
  0x1b   :  { %v226_v16 = vld [vmem:[#allocation5 + $0xa8] sm:$0xff]  ;;  %v369_v17 = vmul.f32 %v225_v12, %v81_v11  ;;  %v227_v20 = vld [vmem:[#allocation5 + $0xb0] sm:$0xff]  ;;  %v84_v23 = vld [vmem:[#allocation2 + $0xb8] sm:$0xff] }
  0x1c   :  { %v500_v38 = vadd.f32 %v499_v31, %v356_v30  ;;  %v370_v21 = vmul.f32 %v226_v16, %v82_v15  ;;  %v228_v24 = vld [vmem:[#allocation5 + $0xb8] sm:$0xff]  ;;  %v371_v25 = vmul.f32 %v227_v20, %v83_v19  ;;  %v85_v27 = vld [vmem:[#allocation2 + $0xc0] sm:$0xff]  ;;  %v86_v31 = vld [vmem:[#allocation2 + $0xc8] sm:$0xff] }
  0x1d   :  { %v229_v28 = vld [vmem:[#allocation5 + $0xc0] sm:$0xff]  ;;  %v372_v29 = vmul.f32 %v228_v24, %v84_v23  ;;  %v230_v32 = vld [vmem:[#allocation5 + $0xc8] sm:$0xff]  ;;  %v87_v35 = vld [vmem:[#allocation2 + $0xd0] sm:$0xff] }
  0x1e   :  { %v501_v42 = vadd.f32 %v500_v38, %v357_v34  ;;  %v373_v33 = vmul.f32 %v229_v28, %v85_v27  ;;  %v231_v36 = vld [vmem:[#allocation5 + $0xd0] sm:$0xff]  ;;  %v88_v39 = vld [vmem:[#allocation2 + $0xd8] sm:$0xff]  ;;  %v89_v43 = vld [vmem:[#allocation2 + $0xe0] sm:$0xff] }
  0x1f   :  { %v232_v40 = vld [vmem:[#allocation5 + $0xd8] sm:$0xff]  ;;  %v233_v44 = vld [vmem:[#allocation5 + $0xe0] sm:$0xff]  ;;  %v90_v47 = vld [vmem:[#allocation2 + $0xe8] sm:$0xff] }
  0x20   :  { %v502_v46 = vadd.f32 %v501_v42, %v358_v37  ;;  %v374_v37 = vmul.f32 %v230_v32, %v86_v31  ;;  %v234_v48 = vld [vmem:[#allocation5 + $0xe8] sm:$0xff]  ;;  %v91_v51 = vld [vmem:[#allocation2 + $0xf0] sm:$0xff]  ;;  %v92_v55 = vld [vmem:[#allocation2 + $0xf8] sm:$0xff] }
  0x21   :  { %v235_v52 = vld [vmem:[#allocation5 + $0xf0] sm:$0xff]  ;;  %v236_v56 = vld [vmem:[#allocation5 + $0xf8] sm:$0xff]  ;;  %v93_v59 = vld [vmem:[#allocation2 + $0x100] sm:$0xff] }
  0x22   :  { %v503_v50 = vadd.f32 %v502_v46, %v359_v41  ;;  %v375_v41 = vmul.f32 %v231_v36, %v87_v35  ;;  %v237_v60 = vld [vmem:[#allocation5 + $0x100] sm:$0xff]  ;;  %v94_v63 = vld [vmem:[#allocation2 + $0x108] sm:$0xff]  ;;  %v95_v3 = vld [vmem:[#allocation2 + $0x110] sm:$0xff] }
  0x23   :  { %v238_v0 = vld [vmem:[#allocation5 + $0x108] sm:$0xff]  ;;  %v239_v4 = vld [vmem:[#allocation5 + $0x110] sm:$0xff]  ;;  %v96_v7 = vld [vmem:[#allocation2 + $0x118] sm:$0xff] }
  0x24   :  { %v504_v54 = vadd.f32 %v503_v50, %v360_v45  ;;  %v376_v45 = vmul.f32 %v232_v40, %v88_v39  ;;  %v240_v8 = vld [vmem:[#allocation5 + $0x118] sm:$0xff]  ;;  %v97_v11 = vld [vmem:[#allocation2 + $0x120] sm:$0xff]  ;;  %v98_v15 = vld [vmem:[#allocation2 + $0x128] sm:$0xff] }
  0x25   :  { %v241_v12 = vld [vmem:[#allocation5 + $0x120] sm:$0xff]  ;;  %v242_v16 = vld [vmem:[#allocation5 + $0x128] sm:$0xff]  ;;  %v99_v19 = vld [vmem:[#allocation2 + $0x130] sm:$0xff] }
  0x26   :  { %v505_v58 = vadd.f32 %v504_v54, %v361_v49  ;;  %v377_v49 = vmul.f32 %v233_v44, %v89_v43  ;;  %v243_v20 = vld [vmem:[#allocation5 + $0x130] sm:$0xff]  ;;  %v100_v23 = vld [vmem:[#allocation2 + $0x138] sm:$0xff]  ;;  %v101_v27 = vld [vmem:[#allocation2 + $0x140] sm:$0xff] }
  0x27   :  { %v244_v24 = vld [vmem:[#allocation5 + $0x138] sm:$0xff]  ;;  %v245_v28 = vld [vmem:[#allocation5 + $0x140] sm:$0xff]  ;;  %v102_v31 = vld [vmem:[#allocation2 + $0x148] sm:$0xff] }
  0x28   :  { %v506_v62 = vadd.f32 %v505_v58, %v362_v53  ;;  %v378_v53 = vmul.f32 %v234_v48, %v90_v47  ;;  %v246_v32 = vld [vmem:[#allocation5 + $0x148] sm:$0xff]  ;;  %v103_v35 = vld [vmem:[#allocation2 + $0x150] sm:$0xff]  ;;  %v104_v39 = vld [vmem:[#allocation2 + $0x158] sm:$0xff] }
  0x29   :  { %v247_v36 = vld [vmem:[#allocation5 + $0x150] sm:$0xff]  ;;  %v248_v40 = vld [vmem:[#allocation5 + $0x158] sm:$0xff]  ;;  %v105_v43 = vld [vmem:[#allocation2 + $0x160] sm:$0xff] }
  0x2a   :  { %v507_v2 = vadd.f32 %v506_v62, %v363_v57  ;;  %v379_v57 = vmul.f32 %v235_v52, %v91_v51  ;;  %v249_v44 = vld [vmem:[#allocation5 + $0x160] sm:$0xff]  ;;  %v106_v47 = vld [vmem:[#allocation2 + $0x168] sm:$0xff]  ;;  %v107_v51 = vld [vmem:[#allocation2 + $0x170] sm:$0xff] }
  0x2b   :  { %v250_v48 = vld [vmem:[#allocation5 + $0x168] sm:$0xff]  ;;  %v251_v52 = vld [vmem:[#allocation5 + $0x170] sm:$0xff] }
  0x2c   :  { %v508_v6 = vadd.f32 %v507_v2, %v364_v61  ;;  %v380_v61 = vmul.f32 %v236_v56, %v92_v55  ;;  %v108_v55 = vld [vmem:[#allocation2 + $0x178] sm:$0xff] }
  0x2d   :  { %v252_v56 = vld [vmem:[#allocation5 + $0x178] sm:$0xff] }
  0x2e   :  { %v509_v10 = vadd.f32 %v508_v6, %v365_v1  ;;  %v381_v1 = vmul.f32 %v237_v60, %v93_v59  ;;  %v109_v59 = vld [vmem:[#allocation2 + $0x180] sm:$0xff] }
  0x2f   :  { %v253_v60 = vld [vmem:[#allocation5 + $0x180] sm:$0xff] }
  0x30   :  { %v510_v14 = vadd.f32 %v509_v10, %v366_v5  ;;  %v382_v5 = vmul.f32 %v238_v0, %v94_v63  ;;  %v110_v63 = vld [vmem:[#allocation2 + $0x188] sm:$0xff] }
  0x31   :  { %v254_v0 = vld [vmem:[#allocation5 + $0x188] sm:$0xff] }
  0x32   :  { %v511_v18 = vadd.f32 %v510_v14, %v367_v9  ;;  %v383_v9 = vmul.f32 %v239_v4, %v95_v3  ;;  %v111_v3 = vld [vmem:[#allocation2 + $0x190] sm:$0xff] }
  0x33   :  { %v255_v4 = vld [vmem:[#allocation5 + $0x190] sm:$0xff] }
  0x34   :  { %v512_v22 = vadd.f32 %v511_v18, %v368_v13  ;;  %v384_v13 = vmul.f32 %v240_v8, %v96_v7  ;;  %v112_v7 = vld [vmem:[#allocation2 + $0x198] sm:$0xff] }
  0x35   :  { %v256_v8 = vld [vmem:[#allocation5 + $0x198] sm:$0xff] }
  0x36   :  { %v513_v26 = vadd.f32 %v512_v22, %v369_v17  ;;  %v385_v17 = vmul.f32 %v241_v12, %v97_v11  ;;  %v113_v11 = vld [vmem:[#allocation2 + $0x1a0] sm:$0xff] }
  0x37   :  { %v257_v12 = vld [vmem:[#allocation5 + $0x1a0] sm:$0xff] }
  0x38   :  { %v514_v30 = vadd.f32 %v513_v26, %v370_v21  ;;  %v386_v21 = vmul.f32 %v242_v16, %v98_v15  ;;  %v114_v15 = vld [vmem:[#allocation2 + $0x1a8] sm:$0xff] }
  0x39   :  { %v258_v16 = vld [vmem:[#allocation5 + $0x1a8] sm:$0xff] }
  0x3a   :  { %v515_v34 = vadd.f32 %v514_v30, %v371_v25  ;;  %v387_v25 = vmul.f32 %v243_v20, %v99_v19  ;;  %v115_v19 = vld [vmem:[#allocation2 + $0x1b0] sm:$0xff] }
  0x3b   :  { %v259_v20 = vld [vmem:[#allocation5 + $0x1b0] sm:$0xff] }
  0x3c   :  { %v516_v38 = vadd.f32 %v515_v34, %v372_v29  ;;  %v388_v29 = vmul.f32 %v244_v24, %v100_v23  ;;  %v116_v23 = vld [vmem:[#allocation2 + $0x1b8] sm:$0xff] }
  0x3d   :  { %v260_v24 = vld [vmem:[#allocation5 + $0x1b8] sm:$0xff] }
  0x3e   :  { %v517_v42 = vadd.f32 %v516_v38, %v373_v33  ;;  %v389_v33 = vmul.f32 %v245_v28, %v101_v27  ;;  %v117_v27 = vld [vmem:[#allocation2 + $0x1c0] sm:$0xff] }
  0x3f   :  { %v261_v28 = vld [vmem:[#allocation5 + $0x1c0] sm:$0xff] }
  0x40   :  { %v518_v46 = vadd.f32 %v517_v42, %v374_v37  ;;  %v390_v37 = vmul.f32 %v246_v32, %v102_v31  ;;  %v118_v31 = vld [vmem:[#allocation2 + $0x1c8] sm:$0xff] }
  0x41   :  { %v262_v32 = vld [vmem:[#allocation5 + $0x1c8] sm:$0xff] }
  0x42   :  { %v519_v50 = vadd.f32 %v518_v46, %v375_v41  ;;  %v391_v41 = vmul.f32 %v247_v36, %v103_v35  ;;  %v119_v35 = vld [vmem:[#allocation2 + $0x1d0] sm:$0xff] }
  0x43   :  { %v263_v36 = vld [vmem:[#allocation5 + $0x1d0] sm:$0xff] }
  0x44   :  { %v520_v54 = vadd.f32 %v519_v50, %v376_v45  ;;  %v392_v45 = vmul.f32 %v248_v40, %v104_v39  ;;  %v120_v39 = vld [vmem:[#allocation2 + $0x1d8] sm:$0xff] }
  0x45   :  { %v264_v40 = vld [vmem:[#allocation5 + $0x1d8] sm:$0xff] }
  0x46   :  { %v521_v58 = vadd.f32 %v520_v54, %v377_v49  ;;  %v393_v49 = vmul.f32 %v249_v44, %v105_v43  ;;  %v121_v43 = vld [vmem:[#allocation2 + $0x1e0] sm:$0xff] }
  0x47   :  { %v265_v44 = vld [vmem:[#allocation5 + $0x1e0] sm:$0xff] }
  0x48   :  { %v522_v62 = vadd.f32 %v521_v58, %v378_v53  ;;  %v394_v53 = vmul.f32 %v250_v48, %v106_v47  ;;  %v122_v47 = vld [vmem:[#allocation2 + $0x1e8] sm:$0xff] }
  0x49   :  { %v266_v48 = vld [vmem:[#allocation5 + $0x1e8] sm:$0xff] }
  0x4a   :  { %v523_v2 = vadd.f32 %v522_v62, %v379_v57  ;;  %v395_v57 = vmul.f32 %v251_v52, %v107_v51  ;;  %v123_v51 = vld [vmem:[#allocation2 + $0x1f0] sm:$0xff] }
  0x4b   :  { %v267_v52 = vld [vmem:[#allocation5 + $0x1f0] sm:$0xff] }
  0x4c   :  { %v524_v6 = vadd.f32 %v523_v2, %v380_v61  ;;  %v396_v61 = vmul.f32 %v252_v56, %v108_v55  ;;  %v124_v55 = vld [vmem:[#allocation2 + $0x1f8] sm:$0xff] }
  0x4d   :  { %v268_v56 = vld [vmem:[#allocation5 + $0x1f8] sm:$0xff] }
  0x4e   :  { %v525_v10 = vadd.f32 %v524_v6, %v381_v1  ;;  %v397_v1 = vmul.f32 %v253_v60, %v109_v59  ;;  %v125_v59 = vld [vmem:[#allocation2 + $0x200] sm:$0xff] }
  0x4f   :  { %v269_v60 = vld [vmem:[#allocation5 + $0x200] sm:$0xff] }
  0x50   :  { %v526_v14 = vadd.f32 %v525_v10, %v382_v5  ;;  %v398_v5 = vmul.f32 %v254_v0, %v110_v63  ;;  %v126_v63 = vld [vmem:[#allocation2 + $0x208] sm:$0xff] }
  0x51   :  { %v270_v0 = vld [vmem:[#allocation5 + $0x208] sm:$0xff] }
  0x52   :  { %v527_v18 = vadd.f32 %v526_v14, %v383_v9  ;;  %v399_v9 = vmul.f32 %v255_v4, %v111_v3  ;;  %v127_v3 = vld [vmem:[#allocation2 + $0x210] sm:$0xff] }
  0x53   :  { %v271_v4 = vld [vmem:[#allocation5 + $0x210] sm:$0xff] }
  0x54   :  { %v528_v22 = vadd.f32 %v527_v18, %v384_v13  ;;  %v400_v13 = vmul.f32 %v256_v8, %v112_v7  ;;  %v128_v7 = vld [vmem:[#allocation2 + $0x218] sm:$0xff] }
  0x55   :  { %v272_v8 = vld [vmem:[#allocation5 + $0x218] sm:$0xff] }
  0x56   :  { %v529_v26 = vadd.f32 %v528_v22, %v385_v17  ;;  %v401_v17 = vmul.f32 %v257_v12, %v113_v11  ;;  %v129_v11 = vld [vmem:[#allocation2 + $0x220] sm:$0xff] }
  0x57   :  { %v273_v12 = vld [vmem:[#allocation5 + $0x220] sm:$0xff] }
  0x58   :  { %v530_v30 = vadd.f32 %v529_v26, %v386_v21  ;;  %v402_v21 = vmul.f32 %v258_v16, %v114_v15  ;;  %v130_v15 = vld [vmem:[#allocation2 + $0x228] sm:$0xff] }
  0x59   :  { %v274_v16 = vld [vmem:[#allocation5 + $0x228] sm:$0xff] }
  0x5a   :  { %v531_v34 = vadd.f32 %v530_v30, %v387_v25  ;;  %v403_v25 = vmul.f32 %v259_v20, %v115_v19  ;;  %v131_v19 = vld [vmem:[#allocation2 + $0x230] sm:$0xff] }
  0x5b   :  { %v275_v20 = vld [vmem:[#allocation5 + $0x230] sm:$0xff] }
  0x5c   :  { %v532_v38 = vadd.f32 %v531_v34, %v388_v29  ;;  %v404_v29 = vmul.f32 %v260_v24, %v116_v23  ;;  %v132_v23 = vld [vmem:[#allocation2 + $0x238] sm:$0xff] }
  0x5d   :  { %v276_v24 = vld [vmem:[#allocation5 + $0x238] sm:$0xff] }
  0x5e   :  { %v533_v42 = vadd.f32 %v532_v38, %v389_v33  ;;  %v405_v33 = vmul.f32 %v261_v28, %v117_v27  ;;  %v133_v27 = vld [vmem:[#allocation2 + $0x240] sm:$0xff] }
  0x5f   :  { %v277_v28 = vld [vmem:[#allocation5 + $0x240] sm:$0xff] }
  0x60   :  { %v534_v46 = vadd.f32 %v533_v42, %v390_v37  ;;  %v406_v37 = vmul.f32 %v262_v32, %v118_v31  ;;  %v134_v31 = vld [vmem:[#allocation2 + $0x248] sm:$0xff] }
  0x61   :  { %v278_v32 = vld [vmem:[#allocation5 + $0x248] sm:$0xff] }
  0x62   :  { %v535_v50 = vadd.f32 %v534_v46, %v391_v41  ;;  %v407_v41 = vmul.f32 %v263_v36, %v119_v35  ;;  %v135_v35 = vld [vmem:[#allocation2 + $0x250] sm:$0xff] }
  0x63   :  { %v279_v36 = vld [vmem:[#allocation5 + $0x250] sm:$0xff] }
  0x64   :  { %v536_v54 = vadd.f32 %v535_v50, %v392_v45  ;;  %v408_v45 = vmul.f32 %v264_v40, %v120_v39  ;;  %v136_v39 = vld [vmem:[#allocation2 + $0x258] sm:$0xff] }
  0x65   :  { %v280_v40 = vld [vmem:[#allocation5 + $0x258] sm:$0xff] }
  0x66   :  { %v537_v58 = vadd.f32 %v536_v54, %v393_v49  ;;  %v409_v49 = vmul.f32 %v265_v44, %v121_v43  ;;  %v137_v43 = vld [vmem:[#allocation2 + $0x260] sm:$0xff] }
  0x67   :  { %v281_v44 = vld [vmem:[#allocation5 + $0x260] sm:$0xff] }
  0x68   :  { %v538_v62 = vadd.f32 %v537_v58, %v394_v53  ;;  %v410_v53 = vmul.f32 %v266_v48, %v122_v47  ;;  %v138_v47 = vld [vmem:[#allocation2 + $0x268] sm:$0xff] }
  0x69   :  { %v282_v48 = vld [vmem:[#allocation5 + $0x268] sm:$0xff] }
  0x6a   :  { %v539_v2 = vadd.f32 %v538_v62, %v395_v57  ;;  %v411_v57 = vmul.f32 %v267_v52, %v123_v51  ;;  %v139_v51 = vld [vmem:[#allocation2 + $0x270] sm:$0xff] }
  0x6b   :  { %v283_v52 = vld [vmem:[#allocation5 + $0x270] sm:$0xff] }
  0x6c   :  { %v540_v6 = vadd.f32 %v539_v2, %v396_v61  ;;  %v412_v61 = vmul.f32 %v268_v56, %v124_v55  ;;  %v140_v55 = vld [vmem:[#allocation2 + $0x278] sm:$0xff] }
  0x6d   :  { %v284_v56 = vld [vmem:[#allocation5 + $0x278] sm:$0xff] }
  0x6e   :  { %v541_v10 = vadd.f32 %v540_v6, %v397_v1  ;;  %v413_v1 = vmul.f32 %v269_v60, %v125_v59  ;;  %v141_v59 = vld [vmem:[#allocation2 + $0x280] sm:$0xff] }
  0x6f   :  { %v285_v60 = vld [vmem:[#allocation5 + $0x280] sm:$0xff] }
  0x70   :  { %v542_v14 = vadd.f32 %v541_v10, %v398_v5  ;;  %v414_v5 = vmul.f32 %v270_v0, %v126_v63  ;;  %v142_v63 = vld [vmem:[#allocation2 + $0x288] sm:$0xff] }
  0x71   :  { %v286_v0 = vld [vmem:[#allocation5 + $0x288] sm:$0xff] }
  0x72   :  { %v543_v18 = vadd.f32 %v542_v14, %v399_v9  ;;  %v415_v9 = vmul.f32 %v271_v4, %v127_v3  ;;  %v143_v3 = vld [vmem:[#allocation2 + $0x290] sm:$0xff] }
  0x73   :  { %v287_v4 = vld [vmem:[#allocation5 + $0x290] sm:$0xff] }
  0x74   :  { %v544_v22 = vadd.f32 %v543_v18, %v400_v13  ;;  %v416_v13 = vmul.f32 %v272_v8, %v128_v7  ;;  %v144_v7 = vld [vmem:[#allocation2 + $0x298] sm:$0xff] }
  0x75   :  { %v288_v8 = vld [vmem:[#allocation5 + $0x298] sm:$0xff] }
  0x76   :  { %v545_v26 = vadd.f32 %v544_v22, %v401_v17  ;;  %v417_v17 = vmul.f32 %v273_v12, %v129_v11  ;;  %v145_v11 = vld [vmem:[#allocation2 + $0x2a0] sm:$0xff] }
  0x77   :  { %v289_v12 = vld [vmem:[#allocation5 + $0x2a0] sm:$0xff] }
  0x78   :  { %v546_v30 = vadd.f32 %v545_v26, %v402_v21  ;;  %v418_v21 = vmul.f32 %v274_v16, %v130_v15  ;;  %v146_v15 = vld [vmem:[#allocation2 + $0x2a8] sm:$0xff] }
  0x79   :  { %v290_v16 = vld [vmem:[#allocation5 + $0x2a8] sm:$0xff] }
  0x7a   :  { %v547_v34 = vadd.f32 %v546_v30, %v403_v25  ;;  %v419_v25 = vmul.f32 %v275_v20, %v131_v19  ;;  %v147_v19 = vld [vmem:[#allocation2 + $0x2b0] sm:$0xff] }
  0x7b   :  { %v291_v20 = vld [vmem:[#allocation5 + $0x2b0] sm:$0xff] }
  0x7c   :  { %v548_v38 = vadd.f32 %v547_v34, %v404_v29  ;;  %v420_v29 = vmul.f32 %v276_v24, %v132_v23  ;;  %v148_v23 = vld [vmem:[#allocation2 + $0x2b8] sm:$0xff] }
  0x7d   :  { %v292_v24 = vld [vmem:[#allocation5 + $0x2b8] sm:$0xff] }
  0x7e   :  { %v549_v42 = vadd.f32 %v548_v38, %v405_v33  ;;  %v421_v33 = vmul.f32 %v277_v28, %v133_v27  ;;  %v149_v27 = vld [vmem:[#allocation2 + $0x2c0] sm:$0xff] }
  0x7f   :  { %v293_v28 = vld [vmem:[#allocation5 + $0x2c0] sm:$0xff] }
  0x80   :  { %v550_v46 = vadd.f32 %v549_v42, %v406_v37  ;;  %v422_v37 = vmul.f32 %v278_v32, %v134_v31  ;;  %v150_v31 = vld [vmem:[#allocation2 + $0x2c8] sm:$0xff] }
  0x81   :  { %v294_v32 = vld [vmem:[#allocation5 + $0x2c8] sm:$0xff] }
  0x82   :  { %v551_v50 = vadd.f32 %v550_v46, %v407_v41  ;;  %v423_v41 = vmul.f32 %v279_v36, %v135_v35  ;;  %v151_v35 = vld [vmem:[#allocation2 + $0x2d0] sm:$0xff] }
  0x83   :  { %v295_v36 = vld [vmem:[#allocation5 + $0x2d0] sm:$0xff] }
  0x84   :  { %v552_v54 = vadd.f32 %v551_v50, %v408_v45  ;;  %v424_v45 = vmul.f32 %v280_v40, %v136_v39  ;;  %v152_v39 = vld [vmem:[#allocation2 + $0x2d8] sm:$0xff] }
  0x85   :  { %v296_v40 = vld [vmem:[#allocation5 + $0x2d8] sm:$0xff] }
  0x86   :  { %v553_v58 = vadd.f32 %v552_v54, %v409_v49  ;;  %v425_v49 = vmul.f32 %v281_v44, %v137_v43  ;;  %v153_v43 = vld [vmem:[#allocation2 + $0x2e0] sm:$0xff] }
  0x87   :  { %v297_v44 = vld [vmem:[#allocation5 + $0x2e0] sm:$0xff] }
  0x88   :  { %v554_v62 = vadd.f32 %v553_v58, %v410_v53  ;;  %v426_v53 = vmul.f32 %v282_v48, %v138_v47  ;;  %v154_v47 = vld [vmem:[#allocation2 + $0x2e8] sm:$0xff] }
  0x89   :  { %v298_v48 = vld [vmem:[#allocation5 + $0x2e8] sm:$0xff] }
  0x8a   :  { %v555_v2 = vadd.f32 %v554_v62, %v411_v57  ;;  %v427_v57 = vmul.f32 %v283_v52, %v139_v51  ;;  %v155_v51 = vld [vmem:[#allocation2 + $0x2f0] sm:$0xff] }
  0x8b   :  { %v299_v52 = vld [vmem:[#allocation5 + $0x2f0] sm:$0xff] }
  0x8c   :  { %v556_v6 = vadd.f32 %v555_v2, %v412_v61  ;;  %v428_v61 = vmul.f32 %v284_v56, %v140_v55  ;;  %v156_v55 = vld [vmem:[#allocation2 + $0x2f8] sm:$0xff] }
  0x8d   :  { %v300_v56 = vld [vmem:[#allocation5 + $0x2f8] sm:$0xff] }
  0x8e   :  { %v557_v10 = vadd.f32 %v556_v6, %v413_v1  ;;  %v429_v1 = vmul.f32 %v285_v60, %v141_v59  ;;  %v157_v59 = vld [vmem:[#allocation2 + $0x300] sm:$0xff] }
  0x8f   :  { %v301_v60 = vld [vmem:[#allocation5 + $0x300] sm:$0xff] }
  0x90   :  { %v558_v14 = vadd.f32 %v557_v10, %v414_v5  ;;  %v430_v5 = vmul.f32 %v286_v0, %v142_v63  ;;  %v158_v63 = vld [vmem:[#allocation2 + $0x308] sm:$0xff] }
  0x91   :  { %v302_v0 = vld [vmem:[#allocation5 + $0x308] sm:$0xff] }
  0x92   :  { %v559_v18 = vadd.f32 %v558_v14, %v415_v9  ;;  %v431_v9 = vmul.f32 %v287_v4, %v143_v3  ;;  %v159_v3 = vld [vmem:[#allocation2 + $0x310] sm:$0xff] }
  0x93   :  { %v303_v4 = vld [vmem:[#allocation5 + $0x310] sm:$0xff] }
  0x94   :  { %v560_v22 = vadd.f32 %v559_v18, %v416_v13  ;;  %v432_v13 = vmul.f32 %v288_v8, %v144_v7  ;;  %v160_v7 = vld [vmem:[#allocation2 + $0x318] sm:$0xff] }
  0x95   :  { %v304_v8 = vld [vmem:[#allocation5 + $0x318] sm:$0xff] }
  0x96   :  { %v561_v26 = vadd.f32 %v560_v22, %v417_v17  ;;  %v433_v17 = vmul.f32 %v289_v12, %v145_v11  ;;  %v161_v11 = vld [vmem:[#allocation2 + $0x320] sm:$0xff] }
  0x97   :  { %v305_v12 = vld [vmem:[#allocation5 + $0x320] sm:$0xff] }
  0x98   :  { %v562_v30 = vadd.f32 %v561_v26, %v418_v21  ;;  %v434_v21 = vmul.f32 %v290_v16, %v146_v15  ;;  %v162_v15 = vld [vmem:[#allocation2 + $0x328] sm:$0xff] }
  0x99   :  { %v306_v16 = vld [vmem:[#allocation5 + $0x328] sm:$0xff] }
  0x9a   :  { %v563_v34 = vadd.f32 %v562_v30, %v419_v25  ;;  %v435_v25 = vmul.f32 %v291_v20, %v147_v19  ;;  %v163_v19 = vld [vmem:[#allocation2 + $0x330] sm:$0xff] }
  0x9b   :  { %v307_v20 = vld [vmem:[#allocation5 + $0x330] sm:$0xff] }
  0x9c   :  { %v564_v38 = vadd.f32 %v563_v34, %v420_v29  ;;  %v436_v29 = vmul.f32 %v292_v24, %v148_v23  ;;  %v164_v23 = vld [vmem:[#allocation2 + $0x338] sm:$0xff] }
  0x9d   :  { %v308_v24 = vld [vmem:[#allocation5 + $0x338] sm:$0xff] }
  0x9e   :  { %v565_v42 = vadd.f32 %v564_v38, %v421_v33  ;;  %v437_v33 = vmul.f32 %v293_v28, %v149_v27  ;;  %v165_v27 = vld [vmem:[#allocation2 + $0x340] sm:$0xff] }
  0x9f   :  { %v309_v28 = vld [vmem:[#allocation5 + $0x340] sm:$0xff] }
  0xa0   :  { %v566_v46 = vadd.f32 %v565_v42, %v422_v37  ;;  %v438_v37 = vmul.f32 %v294_v32, %v150_v31  ;;  %v166_v31 = vld [vmem:[#allocation2 + $0x348] sm:$0xff] }
  0xa1   :  { %v310_v32 = vld [vmem:[#allocation5 + $0x348] sm:$0xff] }
  0xa2   :  { %v567_v50 = vadd.f32 %v566_v46, %v423_v41  ;;  %v439_v41 = vmul.f32 %v295_v36, %v151_v35  ;;  %v167_v35 = vld [vmem:[#allocation2 + $0x350] sm:$0xff] }
  0xa3   :  { %v311_v36 = vld [vmem:[#allocation5 + $0x350] sm:$0xff] }
  0xa4   :  { %v568_v54 = vadd.f32 %v567_v50, %v424_v45  ;;  %v440_v45 = vmul.f32 %v296_v40, %v152_v39  ;;  %v168_v39 = vld [vmem:[#allocation2 + $0x358] sm:$0xff] }
  0xa5   :  { %v312_v40 = vld [vmem:[#allocation5 + $0x358] sm:$0xff] }
  0xa6   :  { %v569_v58 = vadd.f32 %v568_v54, %v425_v49  ;;  %v441_v49 = vmul.f32 %v297_v44, %v153_v43  ;;  %v169_v43 = vld [vmem:[#allocation2 + $0x360] sm:$0xff] }
  0xa7   :  { %v313_v44 = vld [vmem:[#allocation5 + $0x360] sm:$0xff] }
  0xa8   :  { %v570_v62 = vadd.f32 %v569_v58, %v426_v53  ;;  %v442_v53 = vmul.f32 %v298_v48, %v154_v47  ;;  %v170_v47 = vld [vmem:[#allocation2 + $0x368] sm:$0xff] }
  0xa9   :  { %v314_v48 = vld [vmem:[#allocation5 + $0x368] sm:$0xff] }
  0xaa   :  { %v571_v2 = vadd.f32 %v570_v62, %v427_v57  ;;  %v443_v57 = vmul.f32 %v299_v52, %v155_v51  ;;  %v171_v51 = vld [vmem:[#allocation2 + $0x370] sm:$0xff] }
  0xab   :  { %v315_v52 = vld [vmem:[#allocation5 + $0x370] sm:$0xff] }
  0xac   :  { %v572_v6 = vadd.f32 %v571_v2, %v428_v61  ;;  %v444_v61 = vmul.f32 %v300_v56, %v156_v55  ;;  %v172_v55 = vld [vmem:[#allocation2 + $0x378] sm:$0xff] }
  0xad   :  { %v316_v56 = vld [vmem:[#allocation5 + $0x378] sm:$0xff] }
  0xae   :  { %v573_v10 = vadd.f32 %v572_v6, %v429_v1  ;;  %v445_v1 = vmul.f32 %v301_v60, %v157_v59  ;;  %v173_v59 = vld [vmem:[#allocation2 + $0x380] sm:$0xff] }
  0xaf   :  { %v317_v60 = vld [vmem:[#allocation5 + $0x380] sm:$0xff] }
  0xb0   :  { %v574_v14 = vadd.f32 %v573_v10, %v430_v5  ;;  %v446_v5 = vmul.f32 %v302_v0, %v158_v63  ;;  %v174_v63 = vld [vmem:[#allocation2 + $0x388] sm:$0xff] }
  0xb1   :  { %v318_v0 = vld [vmem:[#allocation5 + $0x388] sm:$0xff] }
  0xb2   :  { %v575_v18 = vadd.f32 %v574_v14, %v431_v9  ;;  %v447_v9 = vmul.f32 %v303_v4, %v159_v3  ;;  %v175_v3 = vld [vmem:[#allocation2 + $0x390] sm:$0xff] }
  0xb3   :  { %v319_v4 = vld [vmem:[#allocation5 + $0x390] sm:$0xff] }
  0xb4   :  { %v576_v22 = vadd.f32 %v575_v18, %v432_v13  ;;  %v448_v13 = vmul.f32 %v304_v8, %v160_v7  ;;  %v176_v7 = vld [vmem:[#allocation2 + $0x398] sm:$0xff] }
  0xb5   :  { %v320_v8 = vld [vmem:[#allocation5 + $0x398] sm:$0xff] }
  0xb6   :  { %v577_v26 = vadd.f32 %v576_v22, %v433_v17  ;;  %v449_v17 = vmul.f32 %v305_v12, %v161_v11  ;;  %v177_v11 = vld [vmem:[#allocation2 + $0x3a0] sm:$0xff] }
  0xb7   :  { %v321_v12 = vld [vmem:[#allocation5 + $0x3a0] sm:$0xff] }
  0xb8   :  { %v578_v30 = vadd.f32 %v577_v26, %v434_v21  ;;  %v450_v21 = vmul.f32 %v306_v16, %v162_v15  ;;  %v178_v15 = vld [vmem:[#allocation2 + $0x3a8] sm:$0xff] }
  0xb9   :  { %v322_v16 = vld [vmem:[#allocation5 + $0x3a8] sm:$0xff] }
  0xba   :  { %v579_v34 = vadd.f32 %v578_v30, %v435_v25  ;;  %v451_v25 = vmul.f32 %v307_v20, %v163_v19  ;;  %v179_v19 = vld [vmem:[#allocation2 + $0x3b0] sm:$0xff] }
  0xbb   :  { %v323_v20 = vld [vmem:[#allocation5 + $0x3b0] sm:$0xff] }
  0xbc   :  { %v580_v38 = vadd.f32 %v579_v34, %v436_v29  ;;  %v452_v29 = vmul.f32 %v308_v24, %v164_v23  ;;  %v180_v23 = vld [vmem:[#allocation2 + $0x3b8] sm:$0xff] }
  0xbd   :  { %v324_v24 = vld [vmem:[#allocation5 + $0x3b8] sm:$0xff] }
  0xbe   :  { %v581_v42 = vadd.f32 %v580_v38, %v437_v33  ;;  %v453_v33 = vmul.f32 %v309_v28, %v165_v27  ;;  %v181_v27 = vld [vmem:[#allocation2 + $0x3c0] sm:$0xff] }
  0xbf   :  { %v325_v28 = vld [vmem:[#allocation5 + $0x3c0] sm:$0xff] }
  0xc0   :  { %v582_v46 = vadd.f32 %v581_v42, %v438_v37  ;;  %v454_v37 = vmul.f32 %v310_v32, %v166_v31  ;;  %v182_v31 = vld [vmem:[#allocation2 + $0x3c8] sm:$0xff] }
  0xc1   :  { %v326_v32 = vld [vmem:[#allocation5 + $0x3c8] sm:$0xff] }
  0xc2   :  { %v583_v50 = vadd.f32 %v582_v46, %v439_v41  ;;  %v455_v41 = vmul.f32 %v311_v36, %v167_v35  ;;  %v183_v35 = vld [vmem:[#allocation2 + $0x3d0] sm:$0xff] }
  0xc3   :  { %v327_v36 = vld [vmem:[#allocation5 + $0x3d0] sm:$0xff] }
  0xc4   :  { %v584_v54 = vadd.f32 %v583_v50, %v440_v45  ;;  %v456_v45 = vmul.f32 %v312_v40, %v168_v39  ;;  %v184_v39 = vld [vmem:[#allocation2 + $0x3d8] sm:$0xff] }
  0xc5   :  { %v328_v40 = vld [vmem:[#allocation5 + $0x3d8] sm:$0xff] }
  0xc6   :  { %v585_v58 = vadd.f32 %v584_v54, %v441_v49  ;;  %v457_v49 = vmul.f32 %v313_v44, %v169_v43  ;;  %v185_v43 = vld [vmem:[#allocation2 + $0x3e0] sm:$0xff] }
  0xc7   :  { %v329_v44 = vld [vmem:[#allocation5 + $0x3e0] sm:$0xff] }
  0xc8   :  { %v586_v62 = vadd.f32 %v585_v58, %v442_v53  ;;  %v458_v53 = vmul.f32 %v314_v48, %v170_v47  ;;  %v186_v47 = vld [vmem:[#allocation2 + $0x3e8] sm:$0xff] }
  0xc9   :  { %v330_v48 = vld [vmem:[#allocation5 + $0x3e8] sm:$0xff] }
  0xca   :  { %v587_v2 = vadd.f32 %v586_v62, %v443_v57  ;;  %v459_v57 = vmul.f32 %v315_v52, %v171_v51  ;;  %v187_v51 = vld [vmem:[#allocation2 + $0x3f0] sm:$0xff] }
  0xcb   :  { %v331_v52 = vld [vmem:[#allocation5 + $0x3f0] sm:$0xff] }
  0xcc   :  { %v588_v6 = vadd.f32 %v587_v2, %v444_v61  ;;  %v460_v61 = vmul.f32 %v316_v56, %v172_v55  ;;  %v188_v55 = vld [vmem:[#allocation2 + $0x3f8] sm:$0xff] }
  0xcd   :  { %v332_v56 = vld [vmem:[#allocation5 + $0x3f8] sm:$0xff] }
  0xce   :  { %v589_v10 = vadd.f32 %v588_v6, %v445_v1  ;;  %v461_v1 = vmul.f32 %v317_v60, %v173_v59  ;;  %v189_v59 = vld [vmem:[#allocation2 + $0x400] sm:$0xff] }
  0xcf   :  { %v333_v60 = vld [vmem:[#allocation5 + $0x400] sm:$0xff] }
  0xd0   :  { %v590_v14 = vadd.f32 %v589_v10, %v446_v5  ;;  %v462_v5 = vmul.f32 %v318_v0, %v174_v63  ;;  %v190_v63 = vld [vmem:[#allocation2 + $0x408] sm:$0xff] }
  0xd1   :  { %v334_v0 = vld [vmem:[#allocation5 + $0x408] sm:$0xff] }
  0xd2   :  { %v591_v18 = vadd.f32 %v590_v14, %v447_v9  ;;  %v463_v9 = vmul.f32 %v319_v4, %v175_v3  ;;  %v191_v3 = vld [vmem:[#allocation2 + $0x410] sm:$0xff] }
  0xd3   :  { %v335_v4 = vld [vmem:[#allocation5 + $0x410] sm:$0xff] }
  0xd4   :  { %v592_v22 = vadd.f32 %v591_v18, %v448_v13  ;;  %v464_v13 = vmul.f32 %v320_v8, %v176_v7  ;;  %v192_v7 = vld [vmem:[#allocation2 + $0x418] sm:$0xff] }
  0xd5   :  { %v336_v8 = vld [vmem:[#allocation5 + $0x418] sm:$0xff] }
  0xd6   :  { %v593_v26 = vadd.f32 %v592_v22, %v449_v17  ;;  %v465_v17 = vmul.f32 %v321_v12, %v177_v11  ;;  %v193_v11 = vld [vmem:[#allocation2 + $0x420] sm:$0xff] }
  0xd7   :  { %v337_v12 = vld [vmem:[#allocation5 + $0x420] sm:$0xff] }
  0xd8   :  { %v594_v30 = vadd.f32 %v593_v26, %v450_v21  ;;  %v466_v21 = vmul.f32 %v322_v16, %v178_v15  ;;  %v194_v15 = vld [vmem:[#allocation2 + $0x428] sm:$0xff] }
  0xd9   :  { %v338_v16 = vld [vmem:[#allocation5 + $0x428] sm:$0xff] }
  0xda   :  { %v595_v34 = vadd.f32 %v594_v30, %v451_v25  ;;  %v467_v25 = vmul.f32 %v323_v20, %v179_v19  ;;  %v195_v19 = vld [vmem:[#allocation2 + $0x430] sm:$0xff] }
  0xdb   :  { %v339_v20 = vld [vmem:[#allocation5 + $0x430] sm:$0xff] }
  0xdc   :  { %v596_v38 = vadd.f32 %v595_v34, %v452_v29  ;;  %v468_v29 = vmul.f32 %v324_v24, %v180_v23  ;;  %v196_v23 = vld [vmem:[#allocation2 + $0x438] sm:$0xff] }
  0xdd   :  { %v340_v24 = vld [vmem:[#allocation5 + $0x438] sm:$0xff] }
  0xde   :  { %v597_v42 = vadd.f32 %v596_v38, %v453_v33  ;;  %v469_v33 = vmul.f32 %v325_v28, %v181_v27  ;;  %v197_v27 = vld [vmem:[#allocation2 + $0x440] sm:$0xff] }
  0xdf   :  { %v341_v28 = vld [vmem:[#allocation5 + $0x440] sm:$0xff] }
  0xe0   :  { %v598_v46 = vadd.f32 %v597_v42, %v454_v37  ;;  %v470_v37 = vmul.f32 %v326_v32, %v182_v31  ;;  %v198_v31 = vld [vmem:[#allocation2 + $0x448] sm:$0xff] }
  0xe1   :  { %v342_v32 = vld [vmem:[#allocation5 + $0x448] sm:$0xff] }
  0xe2   :  { %v599_v50 = vadd.f32 %v598_v46, %v455_v41  ;;  %v471_v41 = vmul.f32 %v327_v36, %v183_v35  ;;  %v199_v35 = vld [vmem:[#allocation2 + $0x450] sm:$0xff] }
  0xe3   :  { %v343_v36 = vld [vmem:[#allocation5 + $0x450] sm:$0xff] }
  0xe4   :  { %v600_v54 = vadd.f32 %v599_v50, %v456_v45  ;;  %v472_v45 = vmul.f32 %v328_v40, %v184_v39  ;;  %v200_v39 = vld [vmem:[#allocation2 + $0x458] sm:$0xff] }
  0xe5   :  { %v344_v40 = vld [vmem:[#allocation5 + $0x458] sm:$0xff] }
  0xe6   :  { %v601_v58 = vadd.f32 %v600_v54, %v457_v49  ;;  %v473_v49 = vmul.f32 %v329_v44, %v185_v43  ;;  %v201_v43 = vld [vmem:[#allocation2 + $0x460] sm:$0xff] }
  0xe7   :  { %v345_v44 = vld [vmem:[#allocation5 + $0x460] sm:$0xff] }
  0xe8   :  { %v602_v62 = vadd.f32 %v601_v58, %v458_v53  ;;  %v474_v53 = vmul.f32 %v330_v48, %v186_v47  ;;  %v202_v47 = vld [vmem:[#allocation2 + $0x468] sm:$0xff] }
  0xe9   :  { %v346_v48 = vld [vmem:[#allocation5 + $0x468] sm:$0xff] }
  0xea   :  { %v603_v2 = vadd.f32 %v602_v62, %v459_v57  ;;  %v475_v57 = vmul.f32 %v331_v52, %v187_v51  ;;  %v203_v51 = vld [vmem:[#allocation2 + $0x470] sm:$0xff] }
  0xeb   :  { %v347_v52 = vld [vmem:[#allocation5 + $0x470] sm:$0xff] }
  0xec   :  { %v604_v6 = vadd.f32 %v603_v2, %v460_v61  ;;  %v476_v61 = vmul.f32 %v332_v56, %v188_v55  ;;  %v204_v55 = vld [vmem:[#allocation2 + $0x478] sm:$0xff] }
  0xed   :  { %v348_v56 = vld [vmem:[#allocation5 + $0x478] sm:$0xff] }
  0xee   :  { %v605_v10 = vadd.f32 %v604_v6, %v461_v1  ;;  %v477_v1 = vmul.f32 %v333_v60, %v189_v59  ;;  %v492_v59 = vmul.f32 %v348_v56, %v204_v55 }
  0xf0   :  { %v606_v14 = vadd.f32 %v605_v10, %v462_v5  ;;  %v478_v5 = vmul.f32 %v334_v0, %v190_v63 }
  0xf2   :  { %v607_v18 = vadd.f32 %v606_v14, %v463_v9  ;;  %v479_v9 = vmul.f32 %v335_v4, %v191_v3 }
  0xf4   :  { %v608_v22 = vadd.f32 %v607_v18, %v464_v13  ;;  %v480_v13 = vmul.f32 %v336_v8, %v192_v7 }
  0xf6   :  { %v609_v26 = vadd.f32 %v608_v22, %v465_v17  ;;  %v481_v17 = vmul.f32 %v337_v12, %v193_v11 }
  0xf8   :  { %v610_v30 = vadd.f32 %v609_v26, %v466_v21  ;;  %v482_v21 = vmul.f32 %v338_v16, %v194_v15 }
  0xfa   :  { %v611_v34 = vadd.f32 %v610_v30, %v467_v25  ;;  %v483_v25 = vmul.f32 %v339_v20, %v195_v19 }
  0xfc   :  { %v612_v38 = vadd.f32 %v611_v34, %v468_v29  ;;  %v484_v29 = vmul.f32 %v340_v24, %v196_v23 }
  0xfe   :  { %v613_v42 = vadd.f32 %v612_v38, %v469_v33  ;;  %v485_v33 = vmul.f32 %v341_v28, %v197_v27 }
 0x100   :  { %v614_v46 = vadd.f32 %v613_v42, %v470_v37  ;;  %v486_v37 = vmul.f32 %v342_v32, %v198_v31 }
 0x102   :  { %v615_v50 = vadd.f32 %v614_v46, %v471_v41  ;;  %v487_v41 = vmul.f32 %v343_v36, %v199_v35 }
 0x104   :  { %v616_v54 = vadd.f32 %v615_v50, %v472_v45  ;;  %v488_v45 = vmul.f32 %v344_v40, %v200_v39 }
 0x106   :  { %v617_v58 = vadd.f32 %v616_v54, %v473_v49  ;;  %v489_v49 = vmul.f32 %v345_v44, %v201_v43 }
 0x108   :  { %v618_v62 = vadd.f32 %v617_v58, %v474_v53  ;;  %v490_v53 = vmul.f32 %v346_v48, %v202_v47 }
 0x10a   :  { %v619_v2 = vadd.f32 %v618_v62, %v475_v57  ;;  %v491_v57 = vmul.f32 %v347_v52, %v203_v51 }
 0x10c   :  { %v620_v6 = vadd.f32 %v619_v2, %v476_v61 }
 0x10e   :  { %v621_v10 = vadd.f32 %v620_v6, %v477_v1 }
 0x110   :  { %v622_v14 = vadd.f32 %v621_v10, %v478_v5 }
 0x112   :  { %v623_v18 = vadd.f32 %v622_v14, %v479_v9 }
 0x114   :  { %v624_v22 = vadd.f32 %v623_v18, %v480_v13 }
 0x116   :  { %v625_v26 = vadd.f32 %v624_v22, %v481_v17 }
 0x118   :  { %v626_v30 = vadd.f32 %v625_v26, %v482_v21 }
 0x11a   :  { %v627_v34 = vadd.f32 %v626_v30, %v483_v25 }
 0x11c   :  { %v628_v38 = vadd.f32 %v627_v34, %v484_v29 }
 0x11e   :  { %v629_v42 = vadd.f32 %v628_v38, %v485_v33 }
 0x120   :  { %v630_v46 = vadd.f32 %v629_v42, %v486_v37 }
 0x122   :  { %v631_v50 = vadd.f32 %v630_v46, %v487_v41 }
 0x124   :  { %v632_v54 = vadd.f32 %v631_v50, %v488_v45 }
 0x126   :  { %v633_v58 = vadd.f32 %v632_v54, %v489_v49 }
 0x128   :  { %v634_v60 = vadd.f32 %v633_v58, %v490_v53 }
 0x12a   :  { %v635_v61 = vadd.f32 %v634_v60, %v491_v57 }
 0x12c   :  { %v636_v62 = vadd.f32 %v635_v61, %v492_v59 }
 0x12e   :  { %638 = vst [vmem:[#allocation7] sm:$0xff] %v636_v62 }
 0x12f   :  { %649 = dma.vmem_to_hbm [thread:$0]  %s645_s1, 128, %s647_s23, [#allocation4]  }
 0x130   :  { %739 = dma.done.wait [#allocation4], 128  }
 0x131   :  { %740 = vsyncadd [#allocation4], 4294967168 }
 0x132   :  { %654 = vsyncpa [#allocation3], 1 }
 0x133   :  { %655 = vsyncpa [#allocation6], 1 }
 0x134   :  { %656 = vsyncpa [#allocation4], 1 }

</bundles_post_ra>
